<compile_context>
chip_gen: v5e
topology: v5e:2x2
jax: 0.10.0
libtpu: 0.0.40
codegen_flags: <defaults>
</compile_context>

<pallas_src>
import math
import jax
import jax.numpy as jnp
from jax.experimental import pallas as pl
from jax.experimental.pallas import tpu as pltpu

# ---- module hyper-parameters (small, consistent with __init__) -------------
S_DIM = 4
OUTPUT_DIM = 3
LATENT_DIM = 8
HIDDEN_UNITS = 32

IN_DIM = S_DIM * 2 + LATENT_DIM            # 16
OUT_TOTAL = S_DIM * 2 * OUTPUT_DIM         # 24
HALF = OUTPUT_DIM * S_DIM                  # 12 (theta rows of the flat output)

PHI_MAX = math.pi / 2.0
PHI_SCALE = PHI_MAX - (-math.pi / 2.0)     # == pi

MAX_TB = 512                               # batch-tile (lane) size upper bound


def _laplace_kernel(x_ref, w1_ref, b1_ref, w2_ref, b2_ref, w3_ref, b3_ref,
                    scale_ref, out_ref):
    # x_ref: (IN_DIM, TB) -- batch on the lane axis.
    x = x_ref[...]
    # Linear(in_dim, hidden) + Tanh        -> (HIDDEN, TB)
    h1 = jnp.tanh(
        jnp.dot(w1_ref[...], x, preferred_element_type=jnp.float32)
        + b1_ref[...])
    # Linear(hidden, hidden) + Tanh        -> (HIDDEN, TB)
    h2 = jnp.tanh(
        jnp.dot(w2_ref[...], h1, preferred_element_type=jnp.float32)
        + b2_ref[...])
    # Linear(hidden, 2*output_dim*s_dim)   -> (OUT_TOTAL, TB)
    out = (jnp.dot(w3_ref[...], h2, preferred_element_type=jnp.float32)
           + b3_ref[...])
    # Fused lane-dense store: rows 0..11 scaled by pi (theta),
    # rows 12..23 scaled by pi/2 (phi; the "-pi/2 + phi_scale/2" term == 0).
    out_ref[...] = jnp.tanh(out) * scale_ref[...]


def laplace_representation_func(i, params):
    """Pallas forward of LaplaceRepresentationFunc.

    i: any array whose trailing dims flatten to s_dim*2 + latent_dim.
    Returns (theta, phi) with shapes (B, output_dim, s_dim) each.
    """
    x = i.reshape(-1, IN_DIM).astype(jnp.float32)
    B = x.shape[0]
    w1, b1, w2, b2, w3, b3 = params

    # Batch tile: multiple of 128 (lane width); cap padding for tiny batches.
    b128 = 128 * pl.cdiv(B, 128)
    TB = min(MAX_TB, b128)
    B_pad = TB * pl.cdiv(B, TB)

    # Transposed + padded activations: (IN_DIM, B_pad), batch on lanes.
    xT = jnp.pad(x.T, ((0, 0), (0, B_pad - B)))

    # Per-row output scale: theta rows get pi, phi rows get phi_scale/2.
    scale = jnp.concatenate(
        [jnp.full((HALF, 1), math.pi, jnp.float32),
         jnp.full((HALF, 1), PHI_SCALE / 2.0, jnp.float32)], axis=0)

    grid = (B_pad // TB,)
    out_flat = pl.pallas_call(
        _laplace_kernel,
        out_shape=jax.ShapeDtypeStruct((OUT_TOTAL, B_pad), jnp.float32),
        grid=grid,
        in_specs=[
            pl.BlockSpec((IN_DIM, TB), lambda t: (0, t)),                # xT
            pl.BlockSpec((HIDDEN_UNITS, IN_DIM), lambda t: (0, 0)),      # w1
            pl.BlockSpec((HIDDEN_UNITS, 1), lambda t: (0, 0)),           # b1
            pl.BlockSpec((HIDDEN_UNITS, HIDDEN_UNITS), lambda t: (0, 0)),# w2
            pl.BlockSpec((HIDDEN_UNITS, 1), lambda t: (0, 0)),           # b2
            pl.BlockSpec((OUT_TOTAL, HIDDEN_UNITS), lambda t: (0, 0)),   # w3
            pl.BlockSpec((OUT_TOTAL, 1), lambda t: (0, 0)),              # b3
            pl.BlockSpec((OUT_TOTAL, 1), lambda t: (0, 0)),              # scale
        ],
        out_specs=pl.BlockSpec((OUT_TOTAL, TB), lambda t: (0, t)),
        compiler_params=pltpu.CompilerParams(
            dimension_semantics=("parallel",)),
    )(xT, w1, b1, w2, b2, w3, b3, scale)

    # XLA glue: drop batch padding, split theta/phi, restore (B, out, s) shape.
    out_flat = out_flat[:, :B]
    theta = out_flat[:HALF, :].T.reshape(B, OUTPUT_DIM, S_DIM)
    phi = out_flat[HALF:, :].T.reshape(B, OUTPUT_DIM, S_DIM)
    return theta, phi


def _xavier_uniform(key, fan_out, fan_in):
    limit = math.sqrt(6.0 / (fan_in + fan_out))
    # Stored in PyTorch (out, in) layout; kernel computes W @ xT.
    return jax.random.uniform(key, (fan_out, fan_in), jnp.float32,
                              minval=-limit, maxval=limit)


def init_params(key):
    k1, k2, k3, kb1, kb2, kb3 = jax.random.split(key, 6)
    w1 = _xavier_uniform(k1, HIDDEN_UNITS, IN_DIM)
    w2 = _xavier_uniform(k2, HIDDEN_UNITS, HIDDEN_UNITS)
    w3 = _xavier_uniform(k3, OUT_TOTAL, HIDDEN_UNITS)
    # PyTorch Linear default bias init: U(-1/sqrt(fan_in), 1/sqrt(fan_in));
    # biases kept as (out, 1) columns for lane-broadcast in the kernel.
    b1 = jax.random.uniform(kb1, (HIDDEN_UNITS, 1), jnp.float32,
                            minval=-1.0 / math.sqrt(IN_DIM),
                            maxval=1.0 / math.sqrt(IN_DIM))
    b2 = jax.random.uniform(kb2, (HIDDEN_UNITS, 1), jnp.float32,
                            minval=-1.0 / math.sqrt(HIDDEN_UNITS),
                            maxval=1.0 / math.sqrt(HIDDEN_UNITS))
    b3 = jax.random.uniform(kb3, (OUT_TOTAL, 1), jnp.float32,
                            minval=-1.0 / math.sqrt(HIDDEN_UNITS),
                            maxval=1.0 / math.sqrt(HIDDEN_UNITS))
    return (w1, b1, w2, b2, w3, b3)


def _reference(i, params):
    """Pure-JAX reference mirroring the PyTorch forward."""
    x = i.reshape(-1, IN_DIM).astype(jnp.float32)
    w1, b1, w2, b2, w3, b3 = params
    h1 = jnp.tanh(x @ w1.T + b1[:, 0])
    h2 = jnp.tanh(h1 @ w2.T + b2[:, 0])
    out = (h2 @ w3.T + b3[:, 0]).reshape(-1, 2 * OUTPUT_DIM, S_DIM)
    theta = jnp.tanh(out[:, :OUTPUT_DIM, :]) * math.pi
    phi = (jnp.tanh(out[:, OUTPUT_DIM:, :]) * PHI_SCALE / 2.0
           - math.pi / 2.0 + PHI_SCALE / 2.0)
    return theta, phi


def _check(batch, key, params):
    i = jax.random.normal(key, (batch, IN_DIM), jnp.float32)
    theta, phi = laplace_representation_func(i, params)
    jax.block_until_ready((theta, phi))
    theta_ref, phi_ref = _reference(i, params)
    assert theta.shape == (batch, OUTPUT_DIM, S_DIM)
    assert phi.shape == (batch, OUTPUT_DIM, S_DIM)
    assert jnp.allclose(theta, theta_ref, atol=1e-5, rtol=1e-5)
    assert jnp.allclose(phi, phi_ref, atol=1e-5, rtol=1e-5)


if __name__ == "__main__":
    key = jax.random.PRNGKey(0)
    kp, kx1, kx2 = jax.random.split(key, 3)
    params = init_params(kp)

    # Small batch (single padded tile) and a non-multiple-of-tile batch
    # (exercises the grid + padding path).
    _check(8, kx1, params)
    _check(300, kx2, params)

    print("KERNEL_OK")
</pallas_src>

<mosaic_0001>
module attributes {stable_mosaic.version = 11 : i64} {
  func.func @_laplace_kernel(%arg0: i32, %arg1: memref<16x128xf32, #tpu.memory_space<vmem>>, %arg2: memref<32x16xf32, #tpu.memory_space<vmem>>, %arg3: memref<32x1xf32, #tpu.memory_space<vmem>>, %arg4: memref<32x32xf32, #tpu.memory_space<vmem>>, %arg5: memref<32x1xf32, #tpu.memory_space<vmem>>, %arg6: memref<24x32xf32, #tpu.memory_space<vmem>>, %arg7: memref<24x1xf32, #tpu.memory_space<vmem>>, %arg8: memref<24x1xf32, #tpu.memory_space<vmem>>, %arg9: memref<24x128xf32, #tpu.memory_space<vmem>>) attributes {dimension_semantics = [#tpu.dimension_semantics<parallel>], iteration_bounds = array<i64: 1>, scalar_prefetch = 0 : i64, scratch_operands = 0 : i64, tpu.core_type = #tpu.core_type<tc>, window_params = [{transform_indices = @transform_0, window_bounds = array<i64: 16, 128>}, {pipeline_mode = #tpu.pipeline_mode<synchronous>, transform_indices = @transform_1, window_bounds = array<i64: 32, 16>}, {pipeline_mode = #tpu.pipeline_mode<synchronous>, transform_indices = @transform_2, window_bounds = array<i64: 32, 1>}, {pipeline_mode = #tpu.pipeline_mode<synchronous>, transform_indices = @transform_3, window_bounds = array<i64: 32, 32>}, {pipeline_mode = #tpu.pipeline_mode<synchronous>, transform_indices = @transform_4, window_bounds = array<i64: 32, 1>}, {pipeline_mode = #tpu.pipeline_mode<synchronous>, transform_indices = @transform_5, window_bounds = array<i64: 24, 32>}, {pipeline_mode = #tpu.pipeline_mode<synchronous>, transform_indices = @transform_6, window_bounds = array<i64: 24, 1>}, {pipeline_mode = #tpu.pipeline_mode<synchronous>, transform_indices = @transform_7, window_bounds = array<i64: 24, 1>}, {transform_indices = @transform_8, window_bounds = array<i64: 24, 128>}]} {
    %c0 = arith.constant 0 : index
    %c0_0 = arith.constant 0 : index
    %0 = vector.load %arg1[%c0, %c0_0] : memref<16x128xf32, #tpu.memory_space<vmem>>, vector<16x128xf32>
    %c0_1 = arith.constant 0 : index
    %c0_2 = arith.constant 0 : index
    %1 = vector.load %arg2[%c0_1, %c0_2] : memref<32x16xf32, #tpu.memory_space<vmem>>, vector<32x16xf32>
    %cst = arith.constant dense<0.000000e+00> : vector<32x128xf32>
    %2 = tpu.matmul %1, %0, %cst {dimension_numbers = #tpu.dot_dimension_numbers<[1], [0], [0], [1], [0, 0, 1, 1], [], []>} : vector<32x16xf32>, vector<16x128xf32>, vector<32x128xf32> -> vector<32x128xf32>
    %c0_3 = arith.constant 0 : index
    %c0_4 = arith.constant 0 : index
    %3 = vector.load %arg3[%c0_3, %c0_4] : memref<32x1xf32, #tpu.memory_space<vmem>>, vector<32x1xf32>
    %4 = vector.broadcast %3 : vector<32x1xf32> to vector<32x128xf32>
    %5 = arith.addf %2, %4 : vector<32x128xf32>
    %6 = math.tanh %5 : vector<32x128xf32>
    %c0_5 = arith.constant 0 : index
    %c0_6 = arith.constant 0 : index
    %7 = vector.load %arg4[%c0_5, %c0_6] : memref<32x32xf32, #tpu.memory_space<vmem>>, vector<32x32xf32>
    %cst_7 = arith.constant dense<0.000000e+00> : vector<32x128xf32>
    %8 = tpu.matmul %7, %6, %cst_7 {dimension_numbers = #tpu.dot_dimension_numbers<[1], [0], [0], [1], [0, 0, 1, 1], [], []>} : vector<32x32xf32>, vector<32x128xf32>, vector<32x128xf32> -> vector<32x128xf32>
    %c0_8 = arith.constant 0 : index
    %c0_9 = arith.constant 0 : index
    %9 = vector.load %arg5[%c0_8, %c0_9] : memref<32x1xf32, #tpu.memory_space<vmem>>, vector<32x1xf32>
    %10 = vector.broadcast %9 : vector<32x1xf32> to vector<32x128xf32>
    %11 = arith.addf %8, %10 : vector<32x128xf32>
    %12 = math.tanh %11 : vector<32x128xf32>
    %c0_10 = arith.constant 0 : index
    %c0_11 = arith.constant 0 : index
    %13 = vector.load %arg6[%c0_10, %c0_11] : memref<24x32xf32, #tpu.memory_space<vmem>>, vector<24x32xf32>
    %cst_12 = arith.constant dense<0.000000e+00> : vector<24x128xf32>
    %14 = tpu.matmul %13, %12, %cst_12 {dimension_numbers = #tpu.dot_dimension_numbers<[1], [0], [0], [1], [0, 0, 1, 1], [], []>} : vector<24x32xf32>, vector<32x128xf32>, vector<24x128xf32> -> vector<24x128xf32>
    %c0_13 = arith.constant 0 : index
    %c0_14 = arith.constant 0 : index
    %15 = vector.load %arg7[%c0_13, %c0_14] : memref<24x1xf32, #tpu.memory_space<vmem>>, vector<24x1xf32>
    %16 = vector.broadcast %15 : vector<24x1xf32> to vector<24x128xf32>
    %17 = arith.addf %14, %16 : vector<24x128xf32>
    %18 = math.tanh %17 : vector<24x128xf32>
    %c0_15 = arith.constant 0 : index
    %c0_16 = arith.constant 0 : index
    %19 = vector.load %arg8[%c0_15, %c0_16] : memref<24x1xf32, #tpu.memory_space<vmem>>, vector<24x1xf32>
    %20 = vector.broadcast %19 : vector<24x1xf32> to vector<24x128xf32>
    %21 = arith.mulf %18, %20 : vector<24x128xf32>
    %c0_17 = arith.constant 0 : index
    %c0_18 = arith.constant 0 : index
    %22 = vector.load %arg9[%c0_17, %c0_18] : memref<24x128xf32, #tpu.memory_space<vmem>>, vector<24x128xf32>
    tpu.vector_store %arg9[%c0_17, %c0_18], %21 {strides = array<i32>} : memref<24x128xf32, #tpu.memory_space<vmem>>, vector<24x128xf32>,
    return
  }
  func.func @transform_0(%arg0: i32) -> (i32, i32) {
    %c0_i32 = arith.constant 0 : i32
    %c0_i32_0 = arith.constant 0 : i32
    return %c0_i32, %arg0 : i32, i32
  }
  func.func @transform_1(%arg0: i32) -> (i32, i32) {
    %c0_i32 = arith.constant 0 : i32
    %c0_i32_0 = arith.constant 0 : i32
    %c0_i32_1 = arith.constant 0 : i32
    return %c0_i32, %c0_i32_0 : i32, i32
  }
  func.func @transform_2(%arg0: i32) -> (i32, i32) {
    %c0_i32 = arith.constant 0 : i32
    %c0_i32_0 = arith.constant 0 : i32
    %c0_i32_1 = arith.constant 0 : i32
    return %c0_i32, %c0_i32_0 : i32, i32
  }
  func.func @transform_3(%arg0: i32) -> (i32, i32) {
    %c0_i32 = arith.constant 0 : i32
    %c0_i32_0 = arith.constant 0 : i32
    %c0_i32_1 = arith.constant 0 : i32
    return %c0_i32, %c0_i32_0 : i32, i32
  }
  func.func @transform_4(%arg0: i32) -> (i32, i32) {
    %c0_i32 = arith.constant 0 : i32
    %c0_i32_0 = arith.constant 0 : i32
    %c0_i32_1 = arith.constant 0 : i32
    return %c0_i32, %c0_i32_0 : i32, i32
  }
  func.func @transform_5(%arg0: i32) -> (i32, i32) {
    %c0_i32 = arith.constant 0 : i32
    %c0_i32_0 = arith.constant 0 : i32
    %c0_i32_1 = arith.constant 0 : i32
    return %c0_i32, %c0_i32_0 : i32, i32
  }
  func.func @transform_6(%arg0: i32) -> (i32, i32) {
    %c0_i32 = arith.constant 0 : i32
    %c0_i32_0 = arith.constant 0 : i32
    %c0_i32_1 = arith.constant 0 : i32
    return %c0_i32, %c0_i32_0 : i32, i32
  }
  func.func @transform_7(%arg0: i32) -> (i32, i32) {
    %c0_i32 = arith.constant 0 : i32
    %c0_i32_0 = arith.constant 0 : i32
    %c0_i32_1 = arith.constant 0 : i32
    return %c0_i32, %c0_i32_0 : i32, i32
  }
  func.func @transform_8(%arg0: i32) -> (i32, i32) {
    %c0_i32 = arith.constant 0 : i32
    %c0_i32_0 = arith.constant 0 : i32
    return %c0_i32, %arg0 : i32, i32
  }
}

</mosaic_0001>

<bundles_post_ra>
// kernel: tpu_custom_call.1
= control target key start
LH: loop header
LB: loop body
LE: loop exit
PB: predicated region body
PF: predicated region fallthrough
CT: control target
= control target key end

     0   :  { %v353_v3 = vmov 0   ;;  %vm60_vm0 = vcmask 130048   ;;  %s497_s0 = inlined_call_operand.vmem [shape: f32[16,128], index: 0, kind: input, shape index: {}]   ;;  %s498_s1 = inlined_call_operand.vmem [shape: f32[32,16], index: 1, kind: input, shape index: {}]   ;;  %s499_s2 = inlined_call_operand.vmem [shape: f32[32,1], index: 2, kind: input, shape index: {}]   ;;  %s500_s3 = inlined_call_operand.vmem [shape: f32[32,32], index: 3, kind: input, shape index: {}]   ;;  %s501_s4 = inlined_call_operand.vmem [shape: f32[32,1], index: 4, kind: input, shape index: {}]   ;;  %s502_s5 = inlined_call_operand.vmem [shape: f32[24,32], index: 5, kind: input, shape index: {}]   ;;  %s503_s6 = inlined_call_operand.vmem [shape: f32[24,1], index: 6, kind: input, shape index: {}]   ;;  %s504_s7 = inlined_call_operand.vmem [shape: f32[24,1], index: 7, kind: input, shape index: {}]   ;;  %s505_s8 = inlined_call_operand.hbm [shape: f32[24,128], index: 8, kind: output, shape index: {}]  }
   0x1   :  { %v31_v0 = vld [vmem:[%s497_s0 + $0x8] sm:$0xff]  ;;  %v39_v1 = vld [vmem:[%s499_s2 + $0x18] sm:$0xff]  ;;  %303 = vset.pattern.permute.xlu1 %v353_v3  ;;  %302 = vset.pattern.permute.xlu0 %v353_v3  ;;  %v30_v4 = vld [vmem:[%s497_s0] sm:$0xff] }
   0x2   :  { %v37_v2 = vld [vmem:[%s499_s2 + $0x8] sm:$0xff]  ;;  %87 = vmatpush.msra.mxu0 %v31_v0  ;;  %57 = vperm.xlu0 %302, %v39_v1   ;;  %v32_v5 = vld [vmem:[%s498_s1] sm:$0xff]  ;;  %v35_v6 = vld [vmem:[%s498_s1 + $0x18] sm:$0xff] }
   0x3   :  { %47 = vperm.xlu1 %303, %v37_v2   ;;  %292 = vmatpush.msra.mxu1 %v31_v0 }
   0x4   :  { %88 = vmatpush.msra.mxu0 %v30_v4  ;;  %304 = vset.pattern.permute.xlu2 %v353_v3 }
   0x5   :  { %281 = vmatmul.msk.f32.vlgmr.msra.gmra.mxu0 %vm60_vm0, %v32_v5  ;;  %293 = vmatpush.msra.mxu1 %v30_v4 }
   0x6   :  { %13 = vsyncpa [#allocation3], 0  ;;  %284 = vmatmul.msk.f32.vlgmr.msra.gmra.mxu1 %vm60_vm0, %v35_v6  ;;  %v38_v7 = vld [vmem:[%s499_s2 + $0x10] sm:$0xff]  ;;  %v36_v8 = vld [vmem:[%s499_s2] sm:$0xff]  ;;  %vm134_vm1 = vcmask 261120   ;;  %s269_s9 = sshll.u32 %s505_s8, 4  ;;  %s270_s9 = int_to_ptr.hbm [resolvable:$true] %s269_s9 }
   0x7   :  { %v33_v9 = vld [vmem:[%s498_s1 + $0x8] sm:$0xff]  ;;  %v110_v11 = vld [vmem:[%s501_s4] sm:$0xff]  ;;  %v34_v12 = vld [vmem:[%s498_s1 + $0x10] sm:$0xff]  ;;  %s355_s10 = smov 128   ;;  %s356_s11 = smov 8  }
   0x8   :  { %v111_v10 = vld [vmem:[%s501_s4 + $0x8] sm:$0xff]  ;;  %v185_v14 = vld [vmem:[%s503_s6 + $0x10] sm:$0xff]  ;;  %v113_v24 = vld [vmem:[%s501_s4 + $0x18] sm:$0xff] }
   0x9   :  { %v184_v13 = vld [vmem:[%s503_s6 + $0x8] sm:$0xff]  ;;  %v241_v16 = vld [vmem:[%s504_s7 + $0x10] sm:$0xff]  ;;  %131 = vperm.xlu2 %304, %v113_v24   ;;  %v106_v34 = vld [vmem:[%s500_s3] sm:$0xff] }
   0xa   :  { %52 = vperm.xlu0 %302, %v38_v7   ;;  %v240_v15 = vld [vmem:[%s504_s7 + $0x8] sm:$0xff]  ;;  %v112_v31 = vld [vmem:[%s501_s4 + $0x10] sm:$0xff]  ;;  %v183_v37 = vld [vmem:[%s503_s6] sm:$0xff] }
   0xb   :  { %42 = vperm.xlu1 %303, %v36_v8   ;;  %v107_v35 = vld [vmem:[%s500_s3 + $0x8] sm:$0xff]  ;;  %v108_v38 = vld [vmem:[%s500_s3 + $0x10] sm:$0xff]  ;;  %v239_v39 = vld [vmem:[%s504_s7] sm:$0xff] }
   0xc   :  { %v109_v40 = vld [vmem:[%s500_s3 + $0x18] sm:$0xff]  ;;  %v180_v56 = vld [vmem:[%s502_s5] sm:$0xff]  ;;  %v181_v58 = vld [vmem:[%s502_s5 + $0x8] sm:$0xff] }
   0xd   :  { %282 = vmatmul.msk.f32.gmra.mxu0 %vm60_vm0, %v33_v9  ;;  %v182_v59 = vld [vmem:[%s502_s5 + $0x10] sm:$0xff]  ;;  %s354_s5 = smov [#allocation2]  }
   0xe   :  { %s267_s28 = sshll.u32 %s354_s5, 4  ;;  %s268_s28 = int_to_ptr.vmem [resolvable:$true] %s267_s28 }
  0x11   :  { %126 = vperm.xlu2 %304, %v112_v31  }
  0x12   :  { %121 = vperm.xlu0 %302, %v111_v10  }
  0x13   :  { %116 = vperm.xlu1 %303, %v110_v11  }
  0x15   :  { %283 = vmatmul.msk.f32.gmra.mxu0 %vm60_vm0, %v34_v12 }
  0x19   :  { %188 = vperm.xlu2 %304, %v183_v37  }
  0x1a   :  { %193 = vperm.xlu0 %302, %v184_v13  }
  0x1b   :  { %198 = vperm.xlu1 %303, %v185_v14  }
  0x21   :  { %244 = vperm.xlu2 %304, %v239_v39  }
  0x22   :  { %249 = vperm.xlu0 %302, %v240_v15  }
  0x23   :  { %254 = vperm.xlu1 %303, %v241_v16  }
  0x63   :  { %v132_v42 = vpop.permute.xlu2 %131 }
  0x6b   :  { %v127_v44 = vpop.permute.xlu2 %126 }
  0x73   :  { %v189_v60 = vpop.permute.xlu2 %188 }
  0x74   :  { %v58_v18 = vpop.permute.xlu0 %57 }
  0x75   :  { %v48_v21 = vpop.permute.xlu1 %47 }
  0x7b   :  { %v245_v2 = vpop.permute.xlu2 %244 }
  0x7c   :  { %v53_v25 = vpop.permute.xlu0 %52 }
  0x7d   :  { %v43_v29 = vpop.permute.xlu1 %42 }
  0x82   :  { %v90_v17 = vpop.f32.mrf.mxu0 }
  0x83   :  { %v99_v19 = vpop.f32.mrf.mxu1  ;;  %v91_v30 = vadd.f32 %v90_v17, %v43_v29 }
  0x84   :  { %v100_v20 = vadd.f32 %v99_v19, %v58_v18  ;;  %v122_v48 = vpop.permute.xlu0 %121 }
  0x85   :  { %v117_v51 = vpop.permute.xlu1 %116 }
  0x86   :  { %305 = vtanh.f32 %v100_v20 }
  0x8a   :  { %v93_v22 = vpop.f32.mrf.mxu0 }
  0x8b   :  { %v94_v27 = vadd.f32 %v93_v22, %v48_v21 }
  0x8c   :  { %v306_v23 = vpop.eup %305  ;;  %v194_v63 = vpop.permute.xlu0 %193 }
  0x8d   :  { %159 = vmatpush.msrb.mxu1 %v306_v23  ;;  %294 = vmatpush.msra.mxu3 %v306_v23  ;;  %v199_v5 = vpop.permute.xlu1 %198 }
  0x92   :  { %v96_v26 = vpop.f32.mrf.mxu0 }
  0x93   :  { %v97_v28 = vadd.f32 %v96_v26, %v53_v25 }
  0x94   :  { %v250_v8 = vpop.permute.xlu0 %249 }
  0x95   :  { %307 = vtanh.f32 %v97_v28  ;;  %v255_v12 = vpop.permute.xlu1 %254 }
  0x96   :  { %309 = vtanh.f32 %v94_v27 }
  0x97   :  { %311 = vtanh.f32 %v91_v30 }
  0x9b   :  { %v308_v32 = vpop.eup %307 }
  0x9c   :  { %160 = vmatpush.msrb.mxu1 %v308_v32  ;;  %295 = vmatpush.msra.mxu3 %v308_v32  ;;  %v310_v33 = vpop.eup %309 }
  0x9d   :  { %v312_v36 = vpop.eup %311 }
  0x9e   :  { %161 = vmatpush.msrb.mxu1 %v310_v33  ;;  %296 = vmatpush.msra.mxu3 %v310_v33 }
  0xa0   :  { %162 = vmatpush.msrb.mxu1 %v312_v36  ;;  %297 = vmatpush.msra.mxu3 %v312_v36 }
  0xa1   :  { %285 = vmatmul.msk.f32.vlgmr.msrb.gmra.mxu1 %vm134_vm1, %v106_v34  ;;  %286 = vmatmul.msk.f32.vlgmr.msra.gmra.mxu3 %vm134_vm1, %v107_v35 }
  0xa9   :  { %287 = vmatmul.msk.f32.gmra.mxu3 %vm134_vm1, %v108_v38 }
  0xb1   :  { %288 = vmatmul.msk.f32.gmra.mxu3 %vm134_vm1, %v109_v40 }
 0x11e   :  { %v164_v49 = vpop.f32.mrf.mxu1 }
 0x11f   :  { %v165_v52 = vadd.f32 %v164_v49, %v117_v51 }
 0x124   :  { %v167_v41 = vpop.f32.mrf.mxu3 }
 0x125   :  { %v168_v50 = vadd.f32 %v167_v41, %v122_v48 }
 0x12c   :  { %v170_v43 = vpop.f32.mrf.mxu3 }
 0x12d   :  { %v171_v46 = vadd.f32 %v170_v43, %v127_v44 }
 0x134   :  { %v173_v45 = vpop.f32.mrf.mxu3 }
 0x135   :  { %v174_v47 = vadd.f32 %v173_v45, %v132_v42 }
 0x137   :  { %313 = vtanh.f32 %v174_v47 }
 0x138   :  { %315 = vtanh.f32 %v171_v46 }
 0x139   :  { %317 = vtanh.f32 %v168_v50 }
 0x13a   :  { %319 = vtanh.f32 %v165_v52 }
 0x13d   :  { %v314_v53 = vpop.eup %313 }
 0x13e   :  { %222 = vmatpush.msra.mxu2 %v314_v53  ;;  %v316_v54 = vpop.eup %315 }
 0x13f   :  { %v318_v55 = vpop.eup %317 }
 0x140   :  { %223 = vmatpush.msra.mxu2 %v316_v54  ;;  %v320_v57 = vpop.eup %319 }
 0x142   :  { %224 = vmatpush.msra.mxu2 %v318_v55 }
 0x144   :  { %225 = vmatpush.msra.mxu2 %v320_v57 }
 0x145   :  { %289 = vmatmul.msk.f32.vlgmr.msra.gmra.mxu2 %vm134_vm1, %v180_v56 }
 0x14d   :  { %290 = vmatmul.msk.f32.gmra.mxu2 %vm134_vm1, %v181_v58 }
 0x155   :  { %291 = vmatmul.msk.f32.gmra.mxu2 %vm134_vm1, %v182_v59 }
 0x1c8   :  { %v227_v61 = vpop.f32.mrf.mxu2 }
 0x1c9   :  { %v228_v62 = vadd.f32 %v227_v61, %v189_v60 }
 0x1cb   :  { %321 = vtanh.f32 %v228_v62 }
 0x1d0   :  { %v230_v0 = vpop.f32.mrf.mxu2 }
 0x1d1   :  { %v322_v1 = vpop.eup %321  ;;  %v231_v3 = vadd.f32 %v230_v0, %v194_v63 }
 0x1d2   :  { %v257_v4 = vmul.f32 %v322_v1, %v245_v2 }
 0x1d3   :  { %323 = vtanh.f32 %v231_v3 }
 0x1d4   :  { %260 = vst [vmem:[#allocation2] sm:$0xff] %v257_v4 }
 0x1d8   :  { %v233_v6 = vpop.f32.mrf.mxu2 }
 0x1d9   :  { %v324_v7 = vpop.eup %323  ;;  %v234_v9 = vadd.f32 %v233_v6, %v199_v5 }
 0x1da   :  { %v258_v10 = vmul.f32 %v324_v7, %v250_v8 }
 0x1db   :  { %325 = vtanh.f32 %v234_v9 }
 0x1dc   :  { %261 = vst [vmem:[#allocation2 + $0x8] sm:$0xff] %v258_v10 }
 0x1e1   :  { %v326_v11 = vpop.eup %325 }
 0x1e2   :  { %v259_v13 = vmul.f32 %v326_v11, %v255_v12 }
 0x1e4   :  { %262 = vst [vmem:[#allocation2 + $0x10] sm:$0xff] %v259_v13 }
 0x1e5   :  { %275 = dma.vmem_to_hbm [thread:$0]  %s268_s28, 384, %s270_s9, [#allocation3], %s355_s10, %s355_s10, %s356_s11  }
 0x1e6   :  { %351 = dma.done.wait [#allocation3], 384  }
 0x1e7   :  { %352 = vsyncadd [#allocation3], 4294966912 }
 0x1e8   :  { %280 = vsyncpa [#allocation3], 1 }

</bundles_post_ra>
